<compile_context>
chip_gen: v7x
topology: tpu7x:2x2x1
jax: 0.10.0
libtpu: 0.0.40
codegen_flags: <defaults>
</compile_context>

<pallas_src>
import functools

import jax
import jax.numpy as jnp
from jax.experimental import pallas as pl
from jax.experimental.pallas import tpu as pltpu


def _avg_readout_kernel(seq_ref, out_ref, *scratch, n_valid, tn, inv_n,
                        ragged, single_step):
    """Mean over axis 1, one (tb, tn, td) block per grid step.

    Grid = (batch_blocks, lane_blocks, n_blocks); N (reduction) is innermost.
    Accumulator = f32 VMEM scratch (non-f32 output) or the resident f32 output
    block itself (its index_map is constant in the reduction axis).
    """
    if single_step:
        # Whole N in one tile: no accumulator, no init/finalize passes.
        s = jnp.sum(seq_ref[...], axis=1, dtype=jnp.float32)
        out_ref[...] = (s * inv_n).astype(out_ref.dtype)
        return

    k = pl.program_id(2)
    nk = pl.num_programs(2)
    acc = scratch[0] if scratch else out_ref  # out_ref is f32 when no scratch

    @pl.when(k == 0)
    def _init():
        acc[...] = jnp.zeros_like(acc)

    def _accumulate(mask_tail):
        x = seq_ref[...]  # (tb, tn, td), input dtype (no full-tile f32 copy)
        if mask_tail:
            # Ragged final N tile: zero rows past the true length so padding
            # never pollutes the sum. Mask built at (1, tn, 1), broadcast.
            row = jax.lax.broadcasted_iota(jnp.int32, (1, tn, 1), 1)
            x = jnp.where(row < (n_valid - k * tn), x, jnp.zeros_like(x))
        acc[...] += jnp.sum(x, axis=1, dtype=jnp.float32)

    if ragged:
        # Unmasked accumulate for every full tile; masking only on the tail.
        @pl.when(k < nk - 1)
        def _full_tiles():
            _accumulate(mask_tail=False)

        @pl.when(k == nk - 1)
        def _tail_tile():
            _accumulate(mask_tail=True)
    else:
        _accumulate(mask_tail=False)

    @pl.when(k == nk - 1)
    def _finalize():
        out_ref[...] = (acc[...] * inv_n).astype(out_ref.dtype)


def _sublane_pack(itemsize):
    # Rows per packed sublane group: 8 for f32, 16 for bf16, 32 for int8/fp8.
    return max(8, 32 // max(1, itemsize))


def _choose_tiles(B, N, D, itemsize, target_bytes, pack):
    """Pick (tb, tn, td): biggest ~target-sized block, never rounding UP past
    the target (double-buffering must fit scoped VMEM on every generation)."""
    # ---- lane (D) tiling --------------------------------------------------
    td = D
    if D % 256 == 0 and D >= 256:
        if B <= 4:
            # Guarantee >= 2 independent "parallel" blocks so both TensorCores
            # on multi-core parts (v7x) get work even at tiny batch.
            td = D // 2
        # Shrink further (staying 128-aligned) if even a minimal-height tile
        # would blow the target (very wide feature dims).
        while td % 256 == 0 and td * itemsize * pack > target_bytes:
            td //= 2

    row_bytes = td * itemsize
    per_batch = N * row_bytes

    # ---- whole (folded) array per lane chunk fits in one block ------------
    if B * per_batch <= target_bytes:
        return B, N, td

    # ---- whole N per block, tile the batch axis ---------------------------
    if B > 8 and 8 * per_batch <= target_bytes:
        tb = (target_bytes // per_batch) // 8 * 8  # >= 8; rounds DOWN only
        return min(B, tb), N, td

    # ---- a single (<=8-row) batch slab already reaches the target: tile N --
    tb = B if B <= 8 else 8
    tn = (target_bytes // (tb * row_bytes)) // pack * pack
    tn = max(pack, tn)
    if tn >= N:
        tn = N
    return tb, tn, td


def _default_target_bytes():
    """Per-block byte target by generation: bigger blocks on faster-HBM parts
    amortize the ~0.35us per-grid-step overhead; 2x block (double-buffered)
    must stay inside the scoped VMEM default (16 MiB v5e, 32 MiB v6e/v7x)."""
    kind = ""
    try:
        kind = jax.devices()[0].device_kind.lower()
    except Exception:
        pass
    if "v7" in kind:
        return 8 << 20
    if "v6" in kind:
        return 4 << 20
    return 2 << 20  # v5e and unknown: conservative


def avg_readout(seq, *, target_tile_bytes=None):
    """torch.mean(seq, dim=1): seq (B, N, D) -> (B, D). Matches AvgReadout."""
    B, N, D = seq.shape
    orig_dtype = seq.dtype
    if target_tile_bytes is None:
        target_tile_bytes = _default_target_bytes()

    # Lane-density fold: a D < 128 minor dim only fills D of 128 lanes. Fold
    # g = 128//D consecutive N rows into the lane axis (free contiguous
    # reshape); the tiny final (g, D) fold happens outside the kernel.
    fold = 1
    if 0 < D < 128 and 128 % D == 0:
        g = 128 // D
        if N % g == 0 and N >= g:
            fold = g

    if fold > 1:
        seq_k = seq.reshape(B, N // fold, fold * D)
        out_dtype = jnp.float32  # tiny f32 intermediate; cast after the fold
    else:
        seq_k = seq
        out_dtype = orig_dtype

    Bk, Nk, Dk = seq_k.shape
    itemsize = jnp.dtype(seq_k.dtype).itemsize
    pack = _sublane_pack(itemsize)
    tb, tn, td = _choose_tiles(Bk, Nk, Dk, itemsize, target_tile_bytes, pack)

    nb = pl.cdiv(Bk, tb)
    nd = pl.cdiv(Dk, td)
    nk = pl.cdiv(Nk, tn)
    ragged = (Nk % tn) != 0
    single_step = nk == 1
    # f32 outputs accumulate straight into the resident output block; other
    # dtypes need a f32 VMEM scratch accumulator.
    use_scratch = (not single_step) and jnp.dtype(out_dtype) != jnp.float32

    kernel = functools.partial(
        _avg_readout_kernel,
        n_valid=Nk, tn=tn, inv_n=1.0 / N, ragged=ragged, single_step=single_step)

    scratch_shapes = [pltpu.VMEM((tb, td), jnp.float32)] if use_scratch else []

    # Note: ragged final *batch* / *D* tiles are safe -- the out-of-bounds part
    # of the output block write is discarded by Pallas, and only those dropped
    # rows/lanes ever see unspecified input padding.
    out = pl.pallas_call(
        kernel,
        out_shape=jax.ShapeDtypeStruct((Bk, Dk), out_dtype),
        grid=(nb, nd, nk),
        in_specs=[pl.BlockSpec((tb, tn, td), lambda b, dj, k: (b, k, dj))],
        out_specs=pl.BlockSpec((tb, td), lambda b, dj, k: (b, dj)),
        scratch_shapes=scratch_shapes,
        compiler_params=pltpu.CompilerParams(
            dimension_semantics=("parallel", "parallel", "arbitrary"),
        ),
    )(seq_k)

    if fold > 1:
        out = out.reshape(B, fold, D).sum(axis=1)
    return out.astype(orig_dtype)


if __name__ == "__main__":
    key = jax.random.PRNGKey(0)
    k1, k2, k3, k4 = jax.random.split(key, 4)

    # Case 1: small HGNN-style shape (batch=2, nodes=8, hidden=32). D < 128
    # exercises the lane-density fold and the single-block fast path.
    B, N, D = 2, 8, 32
    seq = jax.random.normal(k1, (B, N, D), dtype=jnp.float32)
    out = jax.block_until_ready(avg_readout(seq))
    ref = jnp.mean(seq, axis=1)
    assert out.shape == (B, D) and out.dtype == seq.dtype
    assert jnp.allclose(out, ref, atol=1e-5, rtol=1e-5)

    # Case 2: batch tiling + ragged reduction tiles, f32 accumulate-into-output.
    B2, N2, D2 = 16, 44, 128
    seq2 = jax.random.normal(k2, (B2, N2, D2), dtype=jnp.float32)
    out2 = jax.block_until_ready(avg_readout(seq2, target_tile_bytes=16 * 1024))
    ref2 = jnp.mean(seq2, axis=1)
    assert out2.shape == (B2, D2)
    assert jnp.allclose(out2, ref2, atol=1e-5, rtol=1e-5)

    # Case 3: tiny batch + wide D -> lane (D) tiling gives a second "parallel"
    # grid block (keeps both TensorCores busy on multi-core parts).
    B3, N3, D3 = 2, 64, 512
    seq3 = jax.random.normal(k3, (B3, N3, D3), dtype=jnp.float32)
    out3 = jax.block_until_ready(avg_readout(seq3, target_tile_bytes=64 * 1024))
    ref3 = jnp.mean(seq3, axis=1)
    assert out3.shape == (B3, D3)
    assert jnp.allclose(out3, ref3, atol=1e-5, rtol=1e-5)

    # Case 4: bf16 input, multi-tile reduction -> f32 VMEM scratch accumulator.
    B4, N4, D4 = 16, 44, 128
    seq4 = jax.random.normal(k4, (B4, N4, D4), dtype=jnp.float32).astype(jnp.bfloat16)
    out4 = jax.block_until_ready(avg_readout(seq4, target_tile_bytes=16 * 1024))
    ref4 = jnp.mean(seq4.astype(jnp.float32), axis=1)
    assert out4.shape == (B4, D4) and out4.dtype == jnp.bfloat16
    assert jnp.allclose(out4.astype(jnp.float32), ref4, atol=2e-2, rtol=2e-2)

    print("KERNEL_OK")
</pallas_src>

<mosaic_0001>
module attributes {stable_mosaic.version = 11 : i64} {
  func.func @_avg_readout_kernel(%arg0: i32, %arg1: i32, %arg2: i32, %arg3: memref<2x2x128xf32, #tpu.memory_space<vmem>>, %arg4: memref<2x128xf32, #tpu.memory_space<vmem>>) attributes {dimension_semantics = [#tpu.dimension_semantics<parallel>, #tpu.dimension_semantics<parallel>, #tpu.dimension_semantics<arbitrary>], iteration_bounds = array<i64: 1, 1, 1>, scalar_prefetch = 0 : i64, scratch_operands = 0 : i64, tpu.core_type = #tpu.core_type<tc>, window_params = [{transform_indices = @transform_0, window_bounds = array<i64: 2, 2, 128>}, {transform_indices = @transform_1, window_bounds = array<i64: 2, 128>}]} {
    %c0 = arith.constant 0 : index
    %c0_0 = arith.constant 0 : index
    %c0_1 = arith.constant 0 : index
    %0 = vector.load %arg3[%c0, %c0_0, %c0_1] : memref<2x2x128xf32, #tpu.memory_space<vmem>>, vector<2x2x128xf32>
    %cst = arith.constant dense<0.000000e+00> : vector<2x128xf32>
    %1 = vector.multi_reduction <add>, %0, %cst [1] : vector<2x2x128xf32> to vector<2x128xf32>
    %cst_2 = arith.constant 1.250000e-01 : f32
    %2 = vector.broadcast %cst_2 : f32 to vector<2x128xf32>
    %3 = arith.mulf %1, %2 : vector<2x128xf32>
    %c0_3 = arith.constant 0 : index
    %c0_4 = arith.constant 0 : index
    %4 = vector.load %arg4[%c0_3, %c0_4] : memref<2x128xf32, #tpu.memory_space<vmem>>, vector<2x128xf32>
    tpu.vector_store %arg4[%c0_3, %c0_4], %3 {strides = array<i32>} : memref<2x128xf32, #tpu.memory_space<vmem>>, vector<2x128xf32>,
    return
  }
  func.func @transform_0(%arg0: i32, %arg1: i32, %arg2: i32) -> (i32, i32, i32) {
    %c0_i32 = arith.constant 0 : i32
    return %arg0, %arg2, %arg1 : i32, i32, i32
  }
  func.func @transform_1(%arg0: i32, %arg1: i32, %arg2: i32) -> (i32, i32) {
    %c0_i32 = arith.constant 0 : i32
    return %arg0, %arg1 : i32, i32
  }
}

</mosaic_0001>

<bundles_post_ra>
// kernel: tpu_custom_call.1
= control target key start
LH: loop header
LB: loop body
LE: loop exit
PB: predicated region body
PF: predicated region fallthrough
CT: control target
= control target key end

     0   :  { %6 = vsyncpa [#allocation3], 0  ;;  %s153_s0 = inlined_call_operand.hbm [shape: f32[2,2,128], index: 0, kind: input, shape index: {}]   ;;  %s154_s1 = inlined_call_operand.hbm [shape: f32[2,128], index: 1, kind: output, shape index: {}]  }
   0x1   :  { %7 = vsyncpa [#allocation4], 0  ;;  %s115_s6 = smov [#allocation2]   ;;  %s67_s10 = scalar_lea.hbm %s153_s0, 64 }
   0x2   :  { %s13_s7 = sshll.u32 %s115_s6, 4  ;;  %p68_p0 = scmp.ne.s32.totalorder %s153_s0, %s67_s10  ;;  %s14_s7 = int_to_ptr.vmem [resolvable:$true] %s13_s7 }
   0x3   :  { %p71_p1 = scmp.lt.u32.totalorder %s67_s10, %s153_s0 }
   0x5   :  { %p73_p2 = pnand %p71_p1, %p68_p0 }
   0x7   :  { %76 = shalt.err (!%p73_p2)
}
   0x8   :  { %s77_s15 = scalar_lea.vmem %s14_s7, 64  ;;  %p82_p4 = scmp.lt.s32.totalorder %s14_s7, %s14_s7 }
   0x9   :  { %p78_p3 = scmp.ne.s32.totalorder %s14_s7, %s77_s15  ;;  %p83_p5 = scmp.lt.s32.totalorder %s77_s15, %s77_s15 }
   0xb   :  { %p84_p6 = por %p83_p5, %p82_p4 }
   0xd   :  { %p85_p7 = pnand %p84_p6, %p78_p3 }
   0xf   :  { %88 = shalt.err (!%p85_p7)
}
  0x10   :  { %s116_s16 = smov 32   ;;  %s117_s17 = smov 2  }
  0x11   :  { %19 = dma.hbm_to_vmem [thread:$0]  %s153_s0, 64, %s14_s7, [#allocation3], %s116_s16, %s116_s16, %s117_s17  }
  0x12   :  { %111 = dma.done.wait [#allocation3], 64  }
  0x13   :  { %112 = vsyncadd [#allocation3], 4294967232  ;;  %vm25_vm0 = vcmask 1041408   ;;  %v23_v0 = vld [vmem:[#allocation2] sm:$0x3]  ;;  %s118_s0 = smov [#allocation5]  }
  0x14   :  { %v24_v1 = vld [vmem:[#allocation2 + $0x2] sm:$0x3]  ;;  %v26_v2 = vsel %vm25_vm0, %v23_v0, 0.0  ;;  %s54_s20 = sshll.u32 %s118_s0, 4  ;;  %vm44_vm1 = vcmask 1041409   ;;  %s55_s20 = int_to_ptr.vmem [resolvable:$true] %s54_s20 }
  0x15   :  { %v33_v3 = vsel %vm25_vm0, %v24_v1, 0.0  ;;  %v27_v4 = vrot.slane %v26_v2, 4  ;;  %s89_s21 = scalar_lea.vmem %s55_s20, 32  ;;  %p94_p9 = scmp.lt.s32.totalorder %s55_s20, %s55_s20 }
  0x16   :  { %v34_v5 = vrot.slane %v33_v3, 4  ;;  %p90_p8 = scmp.ne.s32.totalorder %s55_s20, %s89_s21  ;;  %p95_p10 = scmp.lt.s32.totalorder %s89_s21, %s89_s21 }
  0x17   :  { %v28_v6 = vadd.f32 %v27_v4, %v26_v2 }
  0x18   :  { %v35_v7 = vadd.f32 %v34_v5, %v33_v3  ;;  %p96_p11 = por %p95_p10, %p94_p9 }
  0x19   :  { %v29_v8 = vrot.slane %v28_v6, 2 }
  0x1a   :  { %v36_v9 = vrot.slane %v35_v7, 2  ;;  %p97_p12 = pnand %p96_p11, %p90_p8 }
  0x1b   :  { %v30_v10 = vadd.f32 %v29_v8, %v28_v6 }
  0x1c   :  { %v37_v11 = vadd.f32 %v36_v9, %v35_v7 }
  0x1d   :  { %v31_v12 = vrot.slane %v30_v10, 1 }
  0x1e   :  { %v38_v13 = vrot.slane %v37_v11, 1 }
  0x1f   :  { %v32_v14 = vadd.f32 %v31_v12, %v30_v10 }
  0x20   :  { %v39_v15 = vadd.f32 %v38_v13, %v37_v11 }
  0x21   :  { %v40_v16 = vmul.f32 0.125, %v32_v14 }
  0x22   :  { %v41_v17 = vmul.f32 0.125, %v39_v15 }
  0x24   :  { %v45_v18 = vsel %vm44_vm1, %v41_v17, %v40_v16 }
  0x25   :  { %47 = vst [vmem:[#allocation5] sm:$0x3] %v45_v18 }
  0x26   :  { %100 = shalt.err (!%p97_p12)
}
  0x27   :  { %s101_s24 = scalar_lea.hbm %s154_s1, 32 }
  0x28   :  { %p102_p13 = scmp.ne.s32.totalorder %s154_s1, %s101_s24  ;;  %p105_p0 = scmp.lt.u32.totalorder %s101_s24, %s154_s1 }
  0x2a   :  { %p107_p1 = pnand %p105_p0, %p102_p13 }
  0x2c   :  { %110 = shalt.err (!%p107_p1)
}
  0x2d   :  { %57 = dma.vmem_to_hbm [thread:$0]  %s55_s20, 32, %s154_s1, [#allocation4]  }
  0x2e   :  { %113 = dma.done.wait [#allocation4], 32  }
  0x2f   :  { %114 = vsyncadd [#allocation4], 4294967264 }
  0x30   :  { %61 = vsyncpa [#allocation3], 1 }
  0x31   :  { %62 = vsyncpa [#allocation4], 1 }

</bundles_post_ra>
